<compile_context>
chip_gen: v5e
topology: v5e:2x2
jax: 0.10.0
libtpu: 0.0.40
codegen_flags: <defaults>
</compile_context>

<pallas_src>
import functools

import jax
import jax.numpy as jnp
from jax.experimental import pallas as pl
from jax.experimental.pallas import tpu as pltpu

TEMPERATURE = 0.07
BASE_TEMPERATURE = 0.07


def _supcon_kernel(*refs, temperature, base_temperature, tile_m, use_label_mask):
    """One anchor-row tile: [TM, D] x [N, D]^T -> per-row loss [TM, 1]."""
    if use_label_mask:
        anchor_ref, contrast_ref, row_lbl_ref, col_lbl_ref, out_ref = refs
    else:
        anchor_ref, contrast_ref, mask_ref, out_ref = refs

    i = pl.program_id(0)

    a = anchor_ref[...]          # [TM, D], native dtype (bf16 or f32)
    c = contrast_ref[...]        # [N,  D], resident across grid steps

    # (A @ C^T) / T, contracting the feature dim of both operands so no
    # explicit transpose of the contrast tile is emitted; f32 accumulation.
    logits = jax.lax.dot_general(
        a, c,
        dimension_numbers=(((1,), (1,)), ((), ())),
        preferred_element_type=jnp.float32,
    ) * (1.0 / temperature)                                    # [TM, N] f32

    # Numerical stability: subtract per-row max (detach is a no-op in fwd).
    logits = logits - jnp.max(logits, axis=1, keepdims=True)

    tm, n = logits.shape
    row_g = jax.lax.broadcasted_iota(jnp.int32, (tm, n), 0) + i * tile_m
    col_g = jax.lax.broadcasted_iota(jnp.int32, (tm, n), 1)
    not_diag = row_g != col_g                                  # self-pair exclusion

    if use_label_mask:
        # Positive-pair mask rebuilt in-kernel from labels; diagonal folded in.
        pos = jnp.logical_and(row_lbl_ref[...] == col_lbl_ref[...], not_diag)
        pos_f = pos.astype(jnp.float32)                        # [TM, N]
    else:
        pos_f = mask_ref[...] * not_diag.astype(jnp.float32)   # explicit-mask path

    # Denominator: sum of exp(logits) over non-self pairs.
    exp_l = jnp.where(not_diag, jnp.exp(logits), 0.0)          # [TM, N]
    log_denom = jnp.log(jnp.sum(exp_l, axis=1, keepdims=True))  # [TM, 1]

    # sum(mask * log_prob, 1) == sum(mask * logits, 1) - pos_cnt * log_denom,
    # so the [TM, N] log_prob slab is never materialized.
    pos_logit_sum = jnp.sum(pos_f * logits, axis=1, keepdims=True)   # [TM, 1]
    pos_cnt = jnp.sum(pos_f, axis=1, keepdims=True)                  # [TM, 1]

    # Note: pos_cnt == 0 (anchor with no positives) yields NaN, exactly like
    # the PyTorch reference implementation.
    mean_log_prob_pos = (pos_logit_sum - pos_cnt * log_denom) / pos_cnt

    out_ref[...] = (-(temperature / base_temperature) * mean_log_prob_pos
                    ).astype(out_ref.dtype)


def supcon_loss(features, labels=None, mask=None,
                temperature=TEMPERATURE, contrast_mode='all',
                base_temperature=BASE_TEMPERATURE, block_rows=256):
    """JAX/Pallas equivalent of SupConLoss.forward."""
    features = jnp.asarray(features)
    if features.ndim < 3:
        raise ValueError('`features` needs to be [bsz, n_views, ...], '
                         'at least 3 dimensions are required')
    if features.ndim > 3:
        features = features.reshape(features.shape[0], features.shape[1], -1)

    B, V, D = features.shape
    N = V * B

    if labels is not None and mask is not None:
        raise ValueError('Cannot define both `labels` and `mask`')

    use_label_mask = mask is None
    if use_label_mask:
        if labels is None:
            # SimCLR: eye(B) == label-equality of B distinct labels.
            labels = jnp.arange(B, dtype=jnp.int32)
        labels = jnp.asarray(labels).reshape(-1).astype(jnp.int32)
        if labels.shape[0] != B:
            raise ValueError('Num of labels does not match num of features')
    else:
        mask = jnp.asarray(mask, dtype=jnp.float32)

    # contrast_feature = cat(unbind(features, dim=1), dim=0)  -> [V*B, D]
    contrast_feature = jnp.transpose(features, (1, 0, 2)).reshape(N, D)
    if contrast_mode == 'one':
        anchor_feature = features[:, 0]
        anchor_count = 1
    elif contrast_mode == 'all':
        anchor_feature = contrast_feature
        anchor_count = V
    else:
        raise ValueError('Unknown mode: {}'.format(contrast_mode))
    M = anchor_count * B        # number of anchor rows

    # --- anchor-row tiling -------------------------------------------------
    if M <= block_rows:
        TM = M                              # full-extent block, no constraint
    else:
        TM = max(8, (block_rows // 8) * 8)  # multiple of 8 sublanes
    num_tiles = pl.cdiv(M, TM)
    M_pad = num_tiles * TM

    if M_pad != M:
        anchor_feature = jnp.pad(anchor_feature, ((0, M_pad - M), (0, 0)))

    kernel = functools.partial(
        _supcon_kernel,
        temperature=float(temperature),
        base_temperature=float(base_temperature),
        tile_m=TM,
        use_label_mask=use_label_mask,
    )

    in_specs = [
        pl.BlockSpec((TM, D), lambda i: (i, 0)),   # anchor row tile
        pl.BlockSpec((N, D), lambda i: (0, 0)),    # contrast, resident
    ]
    if use_label_mask:
        col_labels = jnp.tile(labels, V).reshape(1, N)          # contrast labels
        if contrast_mode == 'one':
            row_labels = labels
        else:
            row_labels = jnp.tile(labels, V)
        row_labels = row_labels.reshape(-1, 1)
        if M_pad != M:
            row_labels = jnp.pad(row_labels, ((0, M_pad - M), (0, 0)),
                                 constant_values=-1)
        extra_inputs = (row_labels, col_labels)
        in_specs += [
            pl.BlockSpec((TM, 1), lambda i: (i, 0)),            # row labels
            pl.BlockSpec((1, N), lambda i: (0, 0)),             # col labels, resident
        ]
    else:
        # Explicit-mask path: only the [TM, N] row block is DMA'd per step.
        mask_tiled = jnp.tile(mask, (anchor_count, V)).astype(jnp.float32)
        if M_pad != M:
            mask_tiled = jnp.pad(mask_tiled, ((0, M_pad - M), (0, 0)))
        extra_inputs = (mask_tiled,)
        in_specs += [pl.BlockSpec((TM, N), lambda i: (i, 0))]

    per_anchor = pl.pallas_call(
        kernel,
        out_shape=jax.ShapeDtypeStruct((M_pad, 1), jnp.float32),
        grid=(num_tiles,),
        in_specs=in_specs,
        out_specs=pl.BlockSpec((TM, 1), lambda i: (i, 0)),
        compiler_params=pltpu.CompilerParams(
            dimension_semantics=("parallel",)),
    )(anchor_feature, contrast_feature, *extra_inputs)

    # Final mean over the valid anchor rows (padded rows sliced away).
    return jnp.mean(per_anchor[:M, 0])


def _reference_supcon(features, labels=None, mask=None,
                      temperature=TEMPERATURE, base_temperature=BASE_TEMPERATURE,
                      contrast_mode='all'):
    """Pure-JAX reference mirroring the PyTorch forward, for a sanity check."""
    B, V, D = features.shape
    if labels is None and mask is None:
        mask = jnp.eye(B, dtype=jnp.float32)
    elif labels is not None:
        labels = labels.reshape(-1, 1)
        mask = (labels == labels.T).astype(jnp.float32)
    else:
        mask = mask.astype(jnp.float32)

    contrast = jnp.transpose(features, (1, 0, 2)).reshape(V * B, D)
    if contrast_mode == 'one':
        anchor = features[:, 0]
        anchor_count = 1
    else:
        anchor = contrast
        anchor_count = V

    logits = anchor @ contrast.T / temperature
    logits = logits - jnp.max(logits, axis=1, keepdims=True)

    M = anchor.shape[0]
    N = V * B
    mask = jnp.tile(mask, (anchor_count, V))
    logits_mask = jnp.ones((M, N), jnp.float32).at[jnp.arange(M), jnp.arange(M)].set(0.0)
    mask = mask * logits_mask
    exp_logits = jnp.exp(logits) * logits_mask
    log_prob = logits - jnp.log(exp_logits.sum(1, keepdims=True))
    mean_log_prob_pos = (mask * log_prob).sum(1) / mask.sum(1)
    loss = -(temperature / base_temperature) * mean_log_prob_pos
    return loss.mean()


if __name__ == "__main__":
    key = jax.random.PRNGKey(0)
    k_feat, k_lab = jax.random.split(key)

    B, V, D = 4, 2, 32
    # L2-normalized features, as is conventional for SupCon inputs.
    feats = jax.random.normal(k_feat, (B, V, D), dtype=jnp.float32)
    feats = feats / jnp.linalg.norm(feats, axis=-1, keepdims=True)
    labels = jax.random.randint(k_lab, (B,), 0, 2)

    # Supervised, contrast_mode='all'
    loss = jax.block_until_ready(supcon_loss(feats, labels=labels))
    ref = _reference_supcon(feats, labels=labels)
    assert jnp.allclose(loss, ref, rtol=1e-4, atol=1e-4), (loss, ref)

    # Unsupervised SimCLR degenerate case (labels=None, mask=None)
    loss_simclr = jax.block_until_ready(supcon_loss(feats))
    ref_simclr = _reference_supcon(feats)
    assert jnp.allclose(loss_simclr, ref_simclr, rtol=1e-4, atol=1e-4), (
        loss_simclr, ref_simclr)

    # contrast_mode='one'
    loss_one = jax.block_until_ready(
        supcon_loss(feats, labels=labels, contrast_mode='one'))
    ref_one = _reference_supcon(feats, labels=labels, contrast_mode='one')
    assert jnp.allclose(loss_one, ref_one, rtol=1e-4, atol=1e-4), (loss_one, ref_one)

    print("KERNEL_OK")
</pallas_src>

<mosaic_0001>
module attributes {stable_mosaic.version = 11 : i64} {
  func.func @_supcon_kernel(%arg0: i32, %arg1: memref<8x32xf32, #tpu.memory_space<vmem>>, %arg2: memref<8x32xf32, #tpu.memory_space<vmem>>, %arg3: memref<8x1xi32, #tpu.memory_space<vmem>>, %arg4: memref<1x8xi32, #tpu.memory_space<vmem>>, %arg5: memref<8x1xf32, #tpu.memory_space<vmem>>) attributes {dimension_semantics = [#tpu.dimension_semantics<parallel>], iteration_bounds = array<i64: 1>, scalar_prefetch = 0 : i64, scratch_operands = 0 : i64, tpu.core_type = #tpu.core_type<tc>, window_params = [{transform_indices = @transform_0, window_bounds = array<i64: 8, 32>}, {pipeline_mode = #tpu.pipeline_mode<synchronous>, transform_indices = @transform_1, window_bounds = array<i64: 8, 32>}, {transform_indices = @transform_2, window_bounds = array<i64: 8, 1>}, {pipeline_mode = #tpu.pipeline_mode<synchronous>, transform_indices = @transform_3, window_bounds = array<i64: 1, 8>}, {transform_indices = @transform_4, window_bounds = array<i64: 8, 1>}]} {
    %c0 = arith.constant 0 : index
    %c0_0 = arith.constant 0 : index
    %0 = vector.load %arg1[%c0, %c0_0] : memref<8x32xf32, #tpu.memory_space<vmem>>, vector<8x32xf32>
    %c0_1 = arith.constant 0 : index
    %c0_2 = arith.constant 0 : index
    %1 = vector.load %arg2[%c0_1, %c0_2] : memref<8x32xf32, #tpu.memory_space<vmem>>, vector<8x32xf32>
    %cst = arith.constant dense<0.000000e+00> : vector<8x8xf32>
    %2 = tpu.matmul %0, %1, %cst {dimension_numbers = #tpu.dot_dimension_numbers<[1], [1], [0], [0], [0, 0, 1, 0], [], []>} : vector<8x32xf32>, vector<8x32xf32>, vector<8x8xf32> -> vector<8x8xf32>
    %cst_3 = arith.constant 14.2857141 : f32
    %3 = vector.broadcast %cst_3 : f32 to vector<8x8xf32>
    %4 = arith.mulf %2, %3 : vector<8x8xf32>
    %cst_4 = arith.constant dense<0xFF800000> : vector<8xf32>
    %5 = vector.multi_reduction <maximumf>, %4, %cst_4 [1] : vector<8x8xf32> to vector<8xf32>
    %6 = vector.shape_cast %5 : vector<8xf32> to vector<8x1xf32>
    %7 = vector.broadcast %6 : vector<8x1xf32> to vector<8x8xf32>
    %8 = arith.subf %4, %7 : vector<8x8xf32>
    %9 = tpu.iota {dimensions = array<i32: 0>} : vector<8x8xi32>
    %c8_i32 = arith.constant 8 : i32
    %10 = arith.muli %arg0, %c8_i32 : i32
    %11 = vector.broadcast %10 : i32 to vector<8x8xi32>
    %12 = arith.addi %9, %11 : vector<8x8xi32>
    %13 = tpu.iota {dimensions = array<i32: 1>} : vector<8x8xi32>
    %14 = arith.cmpi ne, %12, %13 : vector<8x8xi32>
    %c0_5 = arith.constant 0 : index
    %c0_6 = arith.constant 0 : index
    %15 = vector.load %arg3[%c0_5, %c0_6] : memref<8x1xi32, #tpu.memory_space<vmem>>, vector<8x1xi32>
    %c0_7 = arith.constant 0 : index
    %c0_8 = arith.constant 0 : index
    %16 = vector.load %arg4[%c0_7, %c0_8] : memref<1x8xi32, #tpu.memory_space<vmem>>, vector<1x8xi32>
    %17 = vector.broadcast %15 : vector<8x1xi32> to vector<8x8xi32>
    %18 = vector.broadcast %16 : vector<1x8xi32> to vector<8x8xi32>
    %19 = arith.cmpi eq, %17, %18 : vector<8x8xi32>
    %20 = arith.andi %19, %14 : vector<8x8xi1>
    %21 = arith.extui %20 : vector<8x8xi1> to vector<8x8xi32>
    %22 = arith.sitofp %21 : vector<8x8xi32> to vector<8x8xf32>
    %23 = math.exp %8 : vector<8x8xf32>
    %cst_9 = arith.constant 0.000000e+00 : f32
    %24 = vector.broadcast %cst_9 : f32 to vector<8x8xf32>
    %25 = arith.select %14, %23, %24 : vector<8x8xi1>, vector<8x8xf32>
    %cst_10 = arith.constant dense<0.000000e+00> : vector<8xf32>
    %26 = vector.multi_reduction <add>, %25, %cst_10 [1] : vector<8x8xf32> to vector<8xf32>
    %27 = vector.shape_cast %26 : vector<8xf32> to vector<8x1xf32>
    %28 = math.log %27 : vector<8x1xf32>
    %29 = arith.mulf %22, %8 : vector<8x8xf32>
    %cst_11 = arith.constant dense<0.000000e+00> : vector<8xf32>
    %30 = vector.multi_reduction <add>, %29, %cst_11 [1] : vector<8x8xf32> to vector<8xf32>
    %31 = vector.shape_cast %30 : vector<8xf32> to vector<8x1xf32>
    %cst_12 = arith.constant dense<0.000000e+00> : vector<8xf32>
    %32 = vector.multi_reduction <add>, %22, %cst_12 [1] : vector<8x8xf32> to vector<8xf32>
    %33 = vector.shape_cast %32 : vector<8xf32> to vector<8x1xf32>
    %34 = arith.mulf %33, %28 : vector<8x1xf32>
    %35 = arith.subf %31, %34 : vector<8x1xf32>
    %36 = arith.divf %35, %33 : vector<8x1xf32>
    %cst_13 = arith.constant -1.000000e+00 : f32
    %37 = vector.broadcast %cst_13 : f32 to vector<8x1xf32>
    %38 = arith.mulf %37, %36 : vector<8x1xf32>
    %c0_14 = arith.constant 0 : index
    %c0_15 = arith.constant 0 : index
    %39 = vector.load %arg5[%c0_14, %c0_15] : memref<8x1xf32, #tpu.memory_space<vmem>>, vector<8x1xf32>
    tpu.vector_store %arg5[%c0_14, %c0_15], %38 {strides = array<i32>} : memref<8x1xf32, #tpu.memory_space<vmem>>, vector<8x1xf32>,
    return
  }
  func.func @transform_0(%arg0: i32) -> (i32, i32) {
    %c0_i32 = arith.constant 0 : i32
    %c0_i32_0 = arith.constant 0 : i32
    return %arg0, %c0_i32 : i32, i32
  }
  func.func @transform_1(%arg0: i32) -> (i32, i32) {
    %c0_i32 = arith.constant 0 : i32
    %c0_i32_0 = arith.constant 0 : i32
    %c0_i32_1 = arith.constant 0 : i32
    return %c0_i32, %c0_i32_0 : i32, i32
  }
  func.func @transform_2(%arg0: i32) -> (i32, i32) {
    %c0_i32 = arith.constant 0 : i32
    %c0_i32_0 = arith.constant 0 : i32
    return %arg0, %c0_i32 : i32, i32
  }
  func.func @transform_3(%arg0: i32) -> (i32, i32) {
    %c0_i32 = arith.constant 0 : i32
    %c0_i32_0 = arith.constant 0 : i32
    %c0_i32_1 = arith.constant 0 : i32
    return %c0_i32, %c0_i32_0 : i32, i32
  }
  func.func @transform_4(%arg0: i32) -> (i32, i32) {
    %c0_i32 = arith.constant 0 : i32
    %c0_i32_0 = arith.constant 0 : i32
    return %arg0, %c0_i32 : i32, i32
  }
}

</mosaic_0001>

<bundles_post_ra>
// kernel: tpu_custom_call.1
= control target key start
LH: loop header
LB: loop body
LE: loop exit
PB: predicated region body
PF: predicated region fallthrough
CT: control target
= control target key end

     0   :  { %9 = vsyncpa [#allocation3], 0  ;;  %s164_s18 = smov [#allocation2]   ;;  %s211_s0 = inlined_call_operand.vmem [shape: f32[8,32], index: 0, kind: input, shape index: {}]   ;;  %s212_s1 = inlined_call_operand.hbm [shape: f32[8,32], index: 1, kind: input, shape index: {}]   ;;  %s213_s2 = inlined_call_operand.vmem [shape: s32[8,1], index: 2, kind: input, shape index: {}]   ;;  %s214_s3 = inlined_call_operand.vmem [shape: s32[1,8], index: 3, kind: input, shape index: {}]   ;;  %s215_s4 = inlined_call_operand.vmem [shape: f32[8,1], index: 4, kind: output, shape index: {}]  }
   0x1   :  { %s17_s17 = sshll.u32 %s212_s1, 4  ;;  %s19_s19 = sshll.u32 %s164_s18, 4  ;;  %s18_s17 = int_to_ptr.hbm [resolvable:$true] %s17_s17  ;;  %s20_s19 = int_to_ptr.vmem [resolvable:$true] %s19_s19 }
   0x2   :  { %22 = dma.hbm_to_vmem [thread:$0]  %s18_s17, 128, %s20_s19, [#allocation3]  }
   0x3   :  { %162 = dma.done.wait [#allocation3], 128  }
   0x4   :  { %163 = vsyncadd [#allocation3], 4294967168  ;;  %vm33_vm0 = vcmask 261120   ;;  %v32_v0 = vld [vmem:[#allocation2] sm:$0xff]  ;;  %v165_v2 = vmov 0   ;;  %vm61_vm1 = vcmask 64512   ;;  %v66_v9 = vlaneseq }
   0x5   :  { %124 = vmatpush.xpose.msk.msra.mxu0 %vm33_vm0, %v32_v0  ;;  %v31_v1 = vld [vmem:[%s211_s0] sm:$0xff]  ;;  %130 = vset.pattern.permute.xlu0 %v165_v2  ;;  %v166_v15 = vmov 0.0   ;;  %vm117_vm9 = vcmask 7168  }
   0x6   :  { %v74_v6 = vld [vmem:[%s213_s2] sm:$0xff]  ;;  %v67_v11 = vshrl.u32 %v66_v9, 7  ;;  %v72_v12 = vand.u32 127, %v66_v9 }
   0x7   :  { %v131_v13 = vld [vmem:[%s214_s3] ss:$0 sm:$0xff] }
   0x8   :  { %125 = vmatmul.msk.f32.vlgmr.msra.gmra.mxu0 %vm33_vm0, %v31_v1  ;;  %vm73_vm2 = vcmp.ne.s32.totalorder %v67_v11, %v72_v12 }
  0x85   :  { %v57_v3 = vpop.f32.mrf.mxu0 }
  0x86   :  { %v60_v4 = vmul.f32 14.285714, %v57_v3 }
  0x88   :  { %v62_v5 = vsel %vm61_vm1, %v60_v4, -inf }
  0x89   :  { %63 = vmax.xlane.f32.xlu0 %v62_v5 }
  0x9d   :  { %77 = vperm.xlu0 %130, %v74_v6  }
  0xfc   :  { %v64_v7 = vpop.xlane.xlu0 %63 }
  0xfd   :  { %v65_v8 = vsub.f32 %v60_v4, %v64_v7 }
  0xff   :  { %v84_v10 = vmul.f32 1.442695, %v65_v8 }
 0x101   :  { %132 = vpow2.f32 %v84_v10 }
 0x107   :  { %v133_v19 = vpop.eup %132 }
 0x108   :  { %v86_v21 = vsel %vm73_vm2, %v133_v19, 0.0 }
 0x109   :  { %v87_v22 = vsel %vm61_vm1, %v86_v21, 0.0 }
 0x10f   :  { %v78_v14 = vpop.permute.xlu0 %77 }
 0x110   :  { %vm80_vm3 = vcmp.eq.s32.totalorder %v78_v14, %v131_v13 }
 0x111   :  { %vm81_vm4 = vmand %vm80_vm3, %vm73_vm2 }
 0x112   :  { %v126_v16 = vsel %vm81_vm4, 1.0, %v166_v15 }
 0x113   :  { %v96_v17 = vsel %vm61_vm1, %v126_v16, 0.0  ;;  %v92_v18 = vmul.f32 %v126_v16, %v65_v8 }
 0x114   :  { %97 = vadd.xlane.f32.xlu1 %v96_v17 }
 0x115   :  { %v93_v20 = vsel %vm61_vm1, %v92_v18, 0.0 }
 0x116   :  { %94 = vadd.xlane.f32.xlu2 %v93_v20 }
 0x11c   :  { %88 = vadd.xlane.f32.xlu1 %v87_v22 }
 0x187   :  { %v98_v23 = vpop.xlane.xlu1 %97 }
 0x188   :  { %134 = vrcp.f32 %v98_v23  ;;  %v112_v31 = vand.u32 2147483648, %v98_v23  ;;  %vm106_vm6 = vweird.f32 %v98_v23  ;;  %v110_v32 = vand.u32 2147483647, %v98_v23 }
 0x189   :  { %v95_v37 = vpop.xlane.xlu2 %94 }
 0x18a   :  { %v113_v36 = vor.u32 1.1754944e-38, %v112_v31  ;;  %vm111_vm8 = vcmp.eq.f32.partialorder %v110_v32, 8.507059e+37 }
 0x18e   :  { %v135_v24 = vpop.eup %134 }
 0x18f   :  { %v102_v25 = vmul.f32 %v135_v24, %v98_v23  ;;  %v89_v26 = vpop.xlane.xlu1 %88  ;;  %vm107_vm5 = vweird.f32 %v135_v24 }
 0x190   :  { %136 = vlog2.f32 %v89_v26  ;;  %vm108_vm7 = vmor %vm106_vm6, %vm107_vm5 }
 0x191   :  { %v103_v27 = vsub.f32 1.0, %v102_v25 }
 0x193   :  { %v104_v28 = vmul.f32 %v135_v24, %v103_v27 }
 0x195   :  { %v105_v29 = vadd.f32 %v135_v24, %v104_v28 }
 0x196   :  { %v137_v30 = vpop.eup %136 }
 0x197   :  { %v91_v33 = vmul.f32 0.6931472, %v137_v30  ;;  %v109_v34 = vsel %vm108_vm7, %v135_v24, %v105_v29 }
 0x198   :  { %v114_v39 = vsel %vm111_vm8, %v113_v36, %v109_v34 }
 0x199   :  { %v99_v35 = vmul.f32 %v98_v23, %v91_v33 }
 0x19b   :  { %v100_v38 = vsub.f32 %v95_v37, %v99_v35 }
 0x19d   :  { %v115_v40 = vmul.f32 %v114_v39, %v100_v38 }
 0x19f   :  { %v116_v41 = vmul.f32 -1.0, %v115_v40 }
 0x1a1   :  { %118 = vst.msk [vmem:[%s215_s4] sm:$0xff] %vm117_vm9, %v116_v41 }
 0x1a2   :  { %123 = vsyncpa [#allocation3], 1 }

</bundles_post_ra>
